<compile_context>
chip_gen: v7x
topology: tpu7x:2x2x1
jax: 0.10.0
libtpu: 0.0.40
codegen_flags: <defaults>
</compile_context>

<pallas_src>
import functools

import jax
import jax.numpy as jnp
from jax.experimental import pallas as pl
from jax.experimental.pallas import tpu as pltpu


# ----------------------------------------------------------------------------- kernels


def _pixel_loss(logits_ref, target_ref, *, num_classes, w0, w1, gamma, ignore_index):
    """Per-pixel focal loss for the current tile -> (rows, 128) float32."""
    tgt = target_ref[...]                                   # (rows, 128) int32
    valid = tgt != ignore_index

    if num_classes == 2:
        # Binary fast path: logpt = softplus(x_other - x_target) (stable form).
        x0 = logits_ref[0].astype(jnp.float32)
        x1 = logits_ref[1].astype(jnp.float32)
        d = x0 - x1
        z = jnp.where(tgt == 1, d, -d)                      # x_other - x_target
        logpt = jnp.maximum(z, 0.0) + jnp.log(1.0 + jnp.exp(-jnp.abs(z)))
    else:
        xs = [logits_ref[c].astype(jnp.float32) for c in range(num_classes)]
        m = xs[0]
        for c in range(1, num_classes):
            m = jnp.maximum(m, xs[c])
        s = jnp.zeros_like(m)
        x_t = jnp.zeros_like(m)
        for c in range(num_classes):
            s = s + jnp.exp(xs[c] - m)
            x_t = jnp.where(tgt == c, xs[c], x_t)
        logpt = (m + jnp.log(s)) - x_t

    # torch cross_entropy sets ignored entries' loss to exactly 0.
    logpt = jnp.where(valid, logpt, 0.0)

    pt = jnp.exp(-logpt)
    one_m_pt = jnp.maximum(1.0 - pt, 0.0)      # clamp fp noise so the power stays finite

    g = float(gamma)
    if g.is_integer() and 0 <= int(g) <= 8:
        gi = int(g)
        if gi == 0:
            focal = jnp.ones_like(one_m_pt)
        else:
            focal = one_m_pt
            for _ in range(gi - 1):            # integer gamma: multiplies, not log+exp
                focal = focal * one_m_pt
    else:
        focal = jnp.power(one_m_pt, jnp.float32(g))

    # class re-weighting: weight[0]*(1-t) + weight[1]*t  ==  w0 + (w1-w0)*t
    tgt_f = tgt.astype(jnp.float32)
    return focal * logpt * (w0 + (w1 - w0) * tgt_f)


def _sublane_fold(x, out_rows):
    """Sum (rows,128) down to (out_rows,128) via static sublane slices (pure VPU adds)."""
    rows = x.shape[0]
    acc = x[0:out_rows, :]
    for k in range(1, rows // out_rows):
        acc = acc + x[k * out_rows:(k + 1) * out_rows, :]
    return acc


def _focal_sum_kernel(logits_ref, target_ref, out_ref, *, num_classes, w0, w1,
                      gamma, ignore_index):
    # logits_ref: (C, rows, 128) input dtype | target_ref: (rows, 128) int32
    # out_ref:    (out_rows, 128) f32 — resident accumulator across the inner grid axis.
    i = pl.program_id(1)

    @pl.when(i == 0)
    def _():
        out_ref[...] = jnp.zeros_like(out_ref)

    loss = _pixel_loss(logits_ref, target_ref, num_classes=num_classes,
                       w0=w0, w1=w1, gamma=gamma, ignore_index=ignore_index)

    rows = loss.shape[0]
    out_rows = out_ref.shape[0]
    if out_rows > 1 and rows % out_rows == 0:
        partial = _sublane_fold(loss, out_rows)             # (out_rows, 128), VPU adds
    else:
        partial = jnp.sum(loss, axis=0, keepdims=True)      # tiny single-tile fallback
    out_ref[...] += partial                                 # lane-dense accumulation


def _focal_none_kernel(logits_ref, target_ref, out_ref, *, num_classes, w0, w1,
                       gamma, ignore_index):
    loss = _pixel_loss(logits_ref, target_ref, num_classes=num_classes,
                       w0=w0, w1=w1, gamma=gamma, ignore_index=ignore_index)
    out_ref[...] = loss.astype(out_ref.dtype)


# ----------------------------------------------------------------------------- wrapper


def _pick_row_tile(num_rows, max_rows):
    """Largest legal sublane tile: full extent, or a multiple-of-8 divisor of num_rows."""
    if num_rows <= max_rows:
        return num_rows
    r = (max_rows // 8) * 8
    while r >= 8:
        if num_rows % r == 0:
            return r
        r -= 8
    return num_rows    # fallback: one full-extent tile (always layout-legal)


def focal_loss_tpu(input_nchw, target_nhw, weight=(1.0, 1.0), gamma=2.0,
                   ignore_index=-100, reduction='mean', max_row_tile=1024):
    """Pallas focal loss. input: (N, C, H, W) float, target: (N, H, W) int."""
    N, C, H, W = input_nchw.shape
    HW = H * W
    if reduction not in ('mean', 'sum', 'none'):
        raise ValueError(f"unknown reduction {reduction!r}")
    assert HW % 128 == 0, "H*W must be a multiple of 128 (lane width) for this kernel"

    R = HW // 128                           # pixel rows of width 128
    itemsize = jnp.dtype(input_nchw.dtype).itemsize
    # Keep double-buffered input blocks comfortably inside VMEM (~12 MiB budget).
    bytes_per_row = (C * itemsize + 4) * 128 * 2
    row_cap = max(8, min(int(max_row_tile), (12 << 20) // bytes_per_row))
    rows_tile = _pick_row_tile(R, row_cap)
    T = R // rows_tile                      # inner grid extent (rows_tile divides R)

    # Free reshapes only -- no transpose, no dtype change in HBM.
    logits = input_nchw.reshape(N, C, R, 128)
    tgt = target_nhw.reshape(N, R, 128).astype(jnp.int32)

    kern_kwargs = dict(num_classes=C, w0=float(weight[0]), w1=float(weight[1]),
                       gamma=float(gamma), ignore_index=int(ignore_index))
    in_specs = [
        pl.BlockSpec((None, C, rows_tile, 128), lambda n, i: (n, 0, i, 0)),
        pl.BlockSpec((None, rows_tile, 128), lambda n, i: (n, i, 0)),
    ]

    if reduction == 'none':
        out = pl.pallas_call(
            functools.partial(_focal_none_kernel, **kern_kwargs),
            out_shape=jax.ShapeDtypeStruct((N, R, 128), input_nchw.dtype),
            grid_spec=pltpu.PrefetchScalarGridSpec(
                num_scalar_prefetch=0,
                grid=(N, T),
                in_specs=in_specs,
                out_specs=pl.BlockSpec((None, rows_tile, 128), lambda n, i: (n, i, 0)),
            ),
            compiler_params=pltpu.CompilerParams(
                dimension_semantics=("parallel", "parallel")),
        )(logits, tgt)
        return out.reshape(N, H, W)

    out_rows = 8 if rows_tile % 8 == 0 else 1
    partials = pl.pallas_call(
        functools.partial(_focal_sum_kernel, **kern_kwargs),
        out_shape=jax.ShapeDtypeStruct((N, out_rows, 128), jnp.float32),
        grid_spec=pltpu.PrefetchScalarGridSpec(
            num_scalar_prefetch=0,
            grid=(N, T),
            in_specs=in_specs,
            out_specs=pl.BlockSpec((None, out_rows, 128), lambda n, i: (n, 0, 0)),
        ),
        compiler_params=pltpu.CompilerParams(
            dimension_semantics=("parallel", "arbitrary")),
    )(logits, tgt)

    total = jnp.sum(partials)               # tiny (N, out_rows, 128) reduce in XLA
    if reduction == 'mean':
        total = total / (N * HW)
    return total


# ----------------------------------------------------------------------------- reference


def _focal_loss_ref(x, t, weight, gamma, ignore_index=-100, reduction='mean'):
    """Plain-JAX reference mirroring the PyTorch code."""
    x = x.astype(jnp.float32)
    lse = jax.scipy.special.logsumexp(x, axis=1)                       # (N,H,W)
    t_safe = jnp.where(t == ignore_index, 0, t).astype(jnp.int32)
    logit_t = jnp.take_along_axis(x, t_safe[:, None], axis=1)[:, 0]
    logpt = jnp.where(t == ignore_index, 0.0, lse - logit_t)
    pt = jnp.exp(-logpt)
    loss = jnp.power(jnp.maximum(1.0 - pt, 0.0), gamma) * logpt
    tf = t.astype(jnp.float32)
    loss = loss * (weight[0] * (1.0 - tf) + weight[1] * tf)
    if reduction == 'mean':
        return loss.mean()
    if reduction == 'sum':
        return loss.sum()
    return loss


if __name__ == "__main__":
    key = jax.random.PRNGKey(0)
    k1, k2, k3, k4, k5, k6 = jax.random.split(key, 6)

    weight = [0.7, 1.3]
    gamma = 2.0

    # Check 1: binary segmentation, single inner grid step, ignore_index entries, mean.
    N, C, H, W = 2, 2, 16, 16
    x = jax.random.normal(k1, (N, C, H, W), dtype=jnp.float32)
    tgt = jax.random.randint(k2, (N, H, W), 0, C, dtype=jnp.int32)
    tgt = tgt.at[0, 0, :4].set(-100)           # exercise ignore_index path
    loss = focal_loss_tpu(x, tgt, weight=weight, gamma=gamma,
                          ignore_index=-100, reduction='mean')
    loss = jax.block_until_ready(loss)
    ref = _focal_loss_ref(x, tgt, weight, gamma, ignore_index=-100, reduction='mean')
    assert jnp.allclose(loss, ref, rtol=1e-5, atol=1e-6), (loss, ref)

    # Check 2: multi-step inner grid (resident output accumulator), 'sum' reduction.
    N2, C2, H2, W2 = 2, 2, 64, 128
    x2 = jax.random.normal(k3, (N2, C2, H2, W2), dtype=jnp.float32)
    tgt2 = jax.random.randint(k4, (N2, H2, W2), 0, C2, dtype=jnp.int32)
    tgt2 = tgt2.at[1, :2, :].set(-100)
    loss2 = focal_loss_tpu(x2, tgt2, weight=weight, gamma=gamma,
                           ignore_index=-100, reduction='sum', max_row_tile=32)
    loss2 = jax.block_until_ready(loss2)
    ref2 = _focal_loss_ref(x2, tgt2, weight, gamma, ignore_index=-100, reduction='sum')
    assert jnp.allclose(loss2, ref2, rtol=1e-5, atol=1e-4), (loss2, ref2)

    # Check 3: per-pixel reduction='none'.
    loss3 = focal_loss_tpu(x, tgt, weight=weight, gamma=gamma,
                           ignore_index=-100, reduction='none')
    loss3 = jax.block_until_ready(loss3)
    ref3 = _focal_loss_ref(x, tgt, weight, gamma, ignore_index=-100, reduction='none')
    assert jnp.allclose(loss3, ref3, rtol=1e-5, atol=1e-5), (jnp.abs(loss3 - ref3).max(),)

    # Check 4: general multi-class path (C=4), mean reduction.
    N4, C4, H4, W4 = 2, 4, 16, 16
    x4 = jax.random.normal(k5, (N4, C4, H4, W4), dtype=jnp.float32)
    tgt4 = jax.random.randint(k6, (N4, H4, W4), 0, C4, dtype=jnp.int32)
    loss4 = focal_loss_tpu(x4, tgt4, weight=weight, gamma=gamma,
                           ignore_index=-100, reduction='mean')
    loss4 = jax.block_until_ready(loss4)
    ref4 = _focal_loss_ref(x4, tgt4, weight, gamma, ignore_index=-100, reduction='mean')
    assert jnp.allclose(loss4, ref4, rtol=1e-5, atol=1e-5), (loss4, ref4)

    print("KERNEL_OK")
</pallas_src>

<mosaic_0001>
module attributes {stable_mosaic.version = 11 : i64} {
  func.func @_focal_sum_kernel(%arg0: i32, %arg1: i32, %arg2: memref<1x2x2x128xf32, #tpu.memory_space<vmem>>, %arg3: memref<1x2x128xi32, #tpu.memory_space<vmem>>, %arg4: memref<1x1x128xf32, #tpu.memory_space<vmem>>) attributes {dimension_semantics = [#tpu.dimension_semantics<parallel>, #tpu.dimension_semantics<arbitrary>], iteration_bounds = array<i64: 2, 1>, scalar_prefetch = 0 : i64, scratch_operands = 0 : i64, tpu.core_type = #tpu.core_type<tc>, window_params = [{transform_indices = @transform_0, window_bounds = array<i64: 1, 2, 2, 128>}, {transform_indices = @transform_1, window_bounds = array<i64: 1, 2, 128>}, {transform_indices = @transform_2, window_bounds = array<i64: 1, 1, 128>}]} {
    %c0_i32 = arith.constant 0 : i32
    %0 = arith.cmpi eq, %arg1, %c0_i32 : i32
    %1 = arith.extui %0 : i1 to i32
    %c0_i32_0 = arith.constant 0 : i32
    %2 = arith.cmpi ne, %1, %c0_i32_0 : i32
    scf.if %2 {
      %cst_26 = arith.constant 0.000000e+00 : f32
      %52 = vector.broadcast %cst_26 : f32 to vector<1x128xf32>
      %c0_27 = arith.constant 0 : index
      %c0_28 = arith.constant 0 : index
      %c0_29 = arith.constant 0 : index
      %53 = vector.load %arg4[%c0_27, %c0_28, %c0_29] : memref<1x1x128xf32, #tpu.memory_space<vmem>>, vector<1x1x128xf32>
      %54 = vector.shape_cast %53 : vector<1x1x128xf32> to vector<1x128xf32>
      %55 = vector.shape_cast %52 : vector<1x128xf32> to vector<1x1x128xf32>
      tpu.vector_store %arg4[%c0_27, %c0_28, %c0_29], %55 {strides = array<i32>} : memref<1x1x128xf32, #tpu.memory_space<vmem>>, vector<1x1x128xf32>,
    } else {
    }
    %c0 = arith.constant 0 : index
    %c0_1 = arith.constant 0 : index
    %c0_2 = arith.constant 0 : index
    %3 = vector.load %arg3[%c0, %c0_1, %c0_2] : memref<1x2x128xi32, #tpu.memory_space<vmem>>, vector<1x2x128xi32>
    %4 = vector.shape_cast %3 : vector<1x2x128xi32> to vector<2x128xi32>
    %c-100_i32 = arith.constant -100 : i32
    %5 = vector.broadcast %c-100_i32 : i32 to vector<2x128xi32>
    %6 = arith.cmpi ne, %4, %5 : vector<2x128xi32>
    %c0_3 = arith.constant 0 : index
    %c0_4 = arith.constant 0 : index
    %c0_5 = arith.constant 0 : index
    %c0_6 = arith.constant 0 : index
    %7 = vector.load %arg2[%c0_3, %c0_4, %c0_5, %c0_6] : memref<1x2x2x128xf32, #tpu.memory_space<vmem>>, vector<1x1x2x128xf32>
    %8 = vector.shape_cast %7 : vector<1x1x2x128xf32> to vector<2x128xf32>
    %c0_7 = arith.constant 0 : index
    %c1 = arith.constant 1 : index
    %c0_8 = arith.constant 0 : index
    %c0_9 = arith.constant 0 : index
    %9 = vector.load %arg2[%c0_7, %c1, %c0_8, %c0_9] : memref<1x2x2x128xf32, #tpu.memory_space<vmem>>, vector<1x1x2x128xf32>
    %10 = vector.shape_cast %9 : vector<1x1x2x128xf32> to vector<2x128xf32>
    %11 = arith.subf %8, %10 : vector<2x128xf32>
    %c1_i32 = arith.constant 1 : i32
    %12 = vector.broadcast %c1_i32 : i32 to vector<2x128xi32>
    %13 = arith.cmpi eq, %4, %12 : vector<2x128xi32>
    %cst = arith.constant 0.000000e+00 : f32
    %14 = vector.broadcast %cst : f32 to vector<2x128xf32>
    %15 = arith.subf %14, %11 : vector<2x128xf32>
    %16 = arith.select %13, %11, %15 : vector<2x128xi1>, vector<2x128xf32>
    %cst_10 = arith.constant 0.000000e+00 : f32
    %17 = vector.broadcast %cst_10 : f32 to vector<2x128xf32>
    %18 = arith.maximumf %16, %17 : vector<2x128xf32>
    %19 = math.absf %16 : vector<2x128xf32>
    %cst_11 = arith.constant 0.000000e+00 : f32
    %20 = vector.broadcast %cst_11 : f32 to vector<2x128xf32>
    %21 = arith.subf %20, %19 : vector<2x128xf32>
    %22 = math.exp %21 : vector<2x128xf32>
    %cst_12 = arith.constant 1.000000e+00 : f32
    %23 = vector.broadcast %cst_12 : f32 to vector<2x128xf32>
    %24 = arith.addf %23, %22 : vector<2x128xf32>
    %25 = math.log %24 : vector<2x128xf32>
    %26 = arith.addf %18, %25 : vector<2x128xf32>
    %cst_13 = arith.constant 0.000000e+00 : f32
    %27 = vector.broadcast %cst_13 : f32 to vector<2x128xf32>
    %28 = arith.select %6, %26, %27 : vector<2x128xi1>, vector<2x128xf32>
    %cst_14 = arith.constant 0.000000e+00 : f32
    %29 = vector.broadcast %cst_14 : f32 to vector<2x128xf32>
    %30 = arith.subf %29, %28 : vector<2x128xf32>
    %31 = math.exp %30 : vector<2x128xf32>
    %cst_15 = arith.constant 1.000000e+00 : f32
    %32 = vector.broadcast %cst_15 : f32 to vector<2x128xf32>
    %33 = arith.subf %32, %31 : vector<2x128xf32>
    %cst_16 = arith.constant 0.000000e+00 : f32
    %34 = vector.broadcast %cst_16 : f32 to vector<2x128xf32>
    %35 = arith.maximumf %33, %34 : vector<2x128xf32>
    %36 = arith.mulf %35, %35 : vector<2x128xf32>
    %37 = arith.sitofp %4 : vector<2x128xi32> to vector<2x128xf32>
    %38 = arith.mulf %36, %28 : vector<2x128xf32>
    %cst_17 = arith.constant 6.000000e-01 : f32
    %39 = vector.broadcast %cst_17 : f32 to vector<2x128xf32>
    %40 = arith.mulf %39, %37 : vector<2x128xf32>
    %cst_18 = arith.constant 0.699999988 : f32
    %41 = vector.broadcast %cst_18 : f32 to vector<2x128xf32>
    %42 = arith.addf %41, %40 : vector<2x128xf32>
    %43 = arith.mulf %38, %42 : vector<2x128xf32>
    %cst_19 = arith.constant dense<0.000000e+00> : vector<128xf32>
    %44 = vector.multi_reduction <add>, %43, %cst_19 [0] : vector<2x128xf32> to vector<128xf32>
    %45 = vector.shape_cast %44 : vector<128xf32> to vector<1x128xf32>
    %c0_20 = arith.constant 0 : index
    %c0_21 = arith.constant 0 : index
    %c0_22 = arith.constant 0 : index
    %46 = vector.load %arg4[%c0_20, %c0_21, %c0_22] : memref<1x1x128xf32, #tpu.memory_space<vmem>>, vector<1x1x128xf32>
    %47 = vector.shape_cast %46 : vector<1x1x128xf32> to vector<1x128xf32>
    %48 = arith.addf %47, %45 : vector<1x128xf32>
    %c0_23 = arith.constant 0 : index
    %c0_24 = arith.constant 0 : index
    %c0_25 = arith.constant 0 : index
    %49 = vector.load %arg4[%c0_23, %c0_24, %c0_25] : memref<1x1x128xf32, #tpu.memory_space<vmem>>, vector<1x1x128xf32>
    %50 = vector.shape_cast %49 : vector<1x1x128xf32> to vector<1x128xf32>
    %51 = vector.shape_cast %48 : vector<1x128xf32> to vector<1x1x128xf32>
    tpu.vector_store %arg4[%c0_23, %c0_24, %c0_25], %51 {strides = array<i32>} : memref<1x1x128xf32, #tpu.memory_space<vmem>>, vector<1x1x128xf32>,
    return
  }
  func.func @transform_0(%arg0: i32, %arg1: i32) -> (i32, i32, i32, i32) {
    %c0_i32 = arith.constant 0 : i32
    %c0_i32_0 = arith.constant 0 : i32
    %c0_i32_1 = arith.constant 0 : i32
    return %arg0, %c0_i32, %arg1, %c0_i32_0 : i32, i32, i32, i32
  }
  func.func @transform_1(%arg0: i32, %arg1: i32) -> (i32, i32, i32) {
    %c0_i32 = arith.constant 0 : i32
    %c0_i32_0 = arith.constant 0 : i32
    return %arg0, %arg1, %c0_i32 : i32, i32, i32
  }
  func.func @transform_2(%arg0: i32, %arg1: i32) -> (i32, i32, i32) {
    %c0_i32 = arith.constant 0 : i32
    %c0_i32_0 = arith.constant 0 : i32
    %c0_i32_1 = arith.constant 0 : i32
    return %arg0, %c0_i32, %c0_i32_0 : i32, i32, i32
  }
}

</mosaic_0001>

<bundles_post_ra>
// kernel: tpu_custom_call.1
= control target key start
LH: loop header
LB: loop body
LE: loop exit
PB: predicated region body
PF: predicated region fallthrough
CT: control target
= control target key end

     0   :  { %7 = vsyncpa [#allocation3], 0  ;;  %s859_s0 = inlined_call_operand.hbm [shape: f32[2,2,2,128], index: 0, kind: input, shape index: {}]   ;;  %s860_s1 = inlined_call_operand.hbm [shape: s32[2,2,128], index: 1, kind: input, shape index: {}]   ;;  %s861_s2 = inlined_call_operand.hbm [shape: f32[2,1,128], index: 2, kind: output, shape index: {}]  }
   0x1   :  { %9 = vsyncpa [#allocation3 + $0x1], 0 }
   0x2   :  { %10 = vsyncpa [#allocation6], 0 }
   0x3   :  { %12 = vsyncpa [#allocation6 + $0x1], 0 }
   0x4   :  { %13 = vsyncpa [#allocation4], 0 }
   0x5   :  { %15 = vsyncpa [#allocation4 + $0x1], 0  ;;  %s637_s9 = smov 0   ;;  %s639_s10 = smov 0  }
   0x6   :  { %s641_s11 = smov 0   ;;  %s643_s12 = smov 0  }
   0x7   :  { %s645_s13 = smov 0   ;;  %s647_s14 = smov 0  }
   0x8 LB: > { %s375_s15 = sadd.s32 4294967295, %s614_s14   ;;  %s376_s16 = sadd.s32 4294967294, %s614_s14   ;;  %s614_s14 = sphi %s647_s14, %s21_s14   ;;  %s610_s13 = sphi %s645_s13, %s880_s13   ;;  %s606_s12 = sphi %s643_s12, %s879_s12   ;;  %s602_s11 = sphi %s641_s11, %s878_s11   ;;  %s598_s10 = sphi %s639_s10, %s877_s10   ;;  %s594_s9 = sphi %s637_s9, %s876_s9  }
   0x9   : > { %s33_s17 = sadd.s32 1, %s610_s13  ;;  %s42_s18 = sadd.s32 1, %s602_s11 }
   0xa   : > { %p35_p0 = scmp.ge.s32.totalorder %s33_s17, 2  ;;  %p49_p1 = scmp.ne.s32.totalorder %s602_s11, %s598_s10 }
   0xb   : > { %p50_p2 = scmp.eq.s32.totalorder %s614_s14, 0  ;;  %p55_p3 = scmp.ne.s32.totalorder %s598_s10, %s594_s9 }
   0xc   : > { %s882_s17 = smov (%p35_p0, %s33_s17), 0  ;;  %p56_p5 = scmp.eq.s32.totalorder %s375_s15, 0 }
   0xd   : > { %p678_p4 = por %p50_p2, %p49_p1  ;;  %s37_s20 = ssub.s32 %s610_s13, %s882_s17 }
   0xe   : > { %p107_p6 = scmp.eq.s32.totalorder %s375_s15, 1  ;;  %p40_p7 = scmp.eq.s32.totalorder %s37_s20, 0 }
   0xf   : > { %p684_p8 = por %p56_p5, %p55_p3  ;;  %p113_p10 = scmp.eq.s32.totalorder %s376_s16, 1 }
  0x10   : > { %p688_p9 = por %p107_p6, %p49_p1  ;;  %p409_p13 = scmp.lt.s32.totalorder %s614_s14, 2 }
  0x11   : > { %s865_s21 = scalar_select %p684_p8, 1, 0 }
  0x12   : > { %s866_s22 = scalar_select %p688_p9, 1, 0 }
  0x13   : > { %s693_s23 = scalar_select %p40_p7, %s602_s11, %s42_s18  }
  0x14   : > { %p695_p11 = por %p113_p10, %p55_p3  ;;  %s702_s25 = sand.u32 1, %s602_s11  }
  0x15   : > { %s379_s26 = sshll.u32 %s702_s25, 2  ;;  %s391_s27 = sshll.u32 %s610_s13, 6 }
  0x16   : > { %s867_s24 = scalar_select %p695_p11, 1, 0 }
  0x17   : > { %s709_s30 = scalar_lea.hbm %s859_s0, %s391_s27  ;;  %s137_s3 = scalar_lea.vmem [#allocation2], %s379_s26 }
  0x18   : > { %s145_s4 = sshll.u32 %s137_s3, 4  ;;  %p715_p0 = pnand %p409_p13, %p678_p4  ;;  %s711_s4 = int_to_ptr.vmem [resolvable:$true] %s145_s4 }
  0x19   : > { %s134_s6 = scalar_lea.sflag [#allocation3], %s702_s25  ;;  %s468_s7 = scalar_lea.hbm %s709_s30, 64 }
  0x1a   : > { %p469_p2 = scmp.ne.s32.totalorder %s709_s30, %s468_s7  ;;  %p470_p3 = pneg %p715_p0 }
  0x1b   : > { %s473_s16 = scalar_lea.hbm %s859_s0, 128  ;;  %p474_p4 = scmp.lt.u32.totalorder %s709_s30, %s859_s0 }
  0x1c   : > { %p471_p5 = pnand %p470_p3, %p469_p2  ;;  %p475_p7 = scmp.lt.u32.totalorder %s473_s16, %s468_s7 }
  0x1d   : > { %p477_p13 = scmp.lt.u32.totalorder %s468_s7, %s709_s30 }
  0x1e   : > { %p472_p6 = pneg %p471_p5  ;;  %p476_p10 = por %p475_p7, %p474_p4 }
  0x20   : > { %p478_p12 = por %p477_p13, %p476_p10 }
  0x22   : > { %p479_p1 = pnand %p478_p12, %p472_p6 }
  0x24   : > { %482 = shalt.err (!%p479_p1)
}
  0x25   : > { %s483_s20 = scalar_lea.vmem %s711_s4, 64  ;;  %s616_s26 = smov [#allocation2]  }
  0x26   : > { %p484_p2 = scmp.ne.s32.totalorder %s711_s4, %s483_s20  ;;  %s488_s27 = sshll.u32 %s616_s26, 4  ;;  %s489_s27 = int_to_ptr.vmem [resolvable:$false] %s488_s27 }
  0x27   : > { %s490_s28 = scalar_lea.vmem %s489_s27, 128  ;;  %p491_p9 = scmp.lt.s32.totalorder %s711_s4, %s489_s27 }
  0x28   : > { %p486_p5 = pnand %p484_p2, %p470_p3  ;;  %p492_p4 = scmp.lt.s32.totalorder %s490_s28, %s483_s20 }
  0x2a   : > { %p487_p11 = pneg %p486_p5  ;;  %p493_p7 = por %p492_p4, %p491_p9 }
  0x2c   : > { %p494_p10 = pnand %p493_p7, %p487_p11 }
  0x2e   : > { %497 = shalt.err (!%p494_p10)
}
  0x2f   : > { %s617_s29 = smov 32   ;;  %s618_s3 = smov 2  }
  0x30   : > { %401 = dma.hbm_to_vmem [thread:$0]  (!%p715_p0), %s709_s30, 64, %s711_s4, %s134_s6, %s617_s29, %s617_s29, %s618_s3  }
  0x31   : > { %p172_p12 = scmp.lt.s32.totalorder %s614_s14, 3  ;;  %s382_s7 = sshll.u32 %s702_s25, 1 }
  0x32   : > { %s383_s8 = sshll.u32 %s610_s13, 5  ;;  %p869_p9 = scmp.ge.s32.totalorder %s614_s14, 1 }
  0x33   : > { %s760_s19 = scalar_lea.hbm %s860_s1, %s383_s8  ;;  %s159_s20 = scalar_lea.vmem [#allocation5], %s382_s7 }
  0x34   : > { %p753_p11 = pnand %p869_p9, %p172_p12  ;;  %s167_s26 = sshll.u32 %s159_s20, 4  ;;  %s168_s26 = int_to_ptr.vmem [resolvable:$true] %s167_s26 }
  0x35   : > { %s156_s30 = scalar_lea.sflag [#allocation6], %s702_s25  ;;  %s498_s4 = scalar_lea.hbm %s760_s19, 32 }
  0x36   : > { %s870_s15 = scalar_select %p753_p11, 1, 0 }
  0x37   : > { %p499_p1 = scmp.ne.s32.totalorder %s760_s19, %s498_s4  ;;  %s503_s28 = scalar_lea.hbm %s860_s1, 64 }
  0x38   : > { %p504_p2 = scmp.lt.u32.totalorder %s760_s19, %s860_s1  ;;  %p505_p5 = scmp.lt.u32.totalorder %s503_s28, %s498_s4 }
  0x39   : > { %p501_p6 = pnand %p499_p1, %p470_p3  ;;  %p507_p7 = scmp.lt.u32.totalorder %s498_s4, %s760_s19 }
  0x3a   : > { %p506_p4 = por %p505_p5, %p504_p2 }
  0x3b   : > { %p502_p13 = pneg %p501_p6 }
  0x3c   : > { %p508_p10 = por %p507_p7, %p506_p4 }
  0x3e   : > { %p509_p12 = pnand %p508_p10, %p502_p13 }
  0x40   : > { %512 = shalt.err (!%p509_p12)
}
  0x41   : > { %s513_s25 = scalar_lea.vmem %s168_s26, 32  ;;  %s619_s7 = smov [#allocation5]  }
  0x42   : > { %p514_p9 = scmp.ne.s32.totalorder %s168_s26, %s513_s25  ;;  %s518_s8 = sshll.u32 %s619_s7, 4  ;;  %s519_s8 = int_to_ptr.vmem [resolvable:$false] %s518_s8 }
  0x43   : > { %s520_s16 = scalar_lea.vmem %s519_s8, 64  ;;  %p521_p8 = scmp.lt.s32.totalorder %s168_s26, %s519_s8 }
  0x44   : > { %p516_p1 = pnand %p514_p9, %p470_p3  ;;  %p522_p11 = scmp.lt.s32.totalorder %s520_s16, %s513_s25 }
  0x46   : > { %p517_p6 = pneg %p516_p1  ;;  %p523_p2 = por %p522_p11, %p521_p8 }
  0x48   : > { %p524_p5 = pnand %p523_p2, %p517_p6 }
  0x4a   : > { %527 = shalt.err (!%p524_p5)
}
  0x4b   : > { %404 = dma.hbm_to_vmem [thread:$0]  (!%p715_p0), %s760_s19, 32, %s168_s26, %s156_s30  }
  0x4c   : > { %p871_p13 = scmp.ne.s32.totalorder %s870_s15, 0 }
  0x4d   : > { %s785_s18 = sand.u32 (!%p871_p13), 1, %s598_s10   ;;  %p872_p3 = scmp.ne.s32.totalorder (!%p871_p13), %s865_s21, 0 }
  0x4e   : > { %176 = sbr.rel (%p871_p13) target bundleno = 185 (0xb9), region = 28  ;;  %s385_s20 = sshll.u32 (!%p871_p13), %s785_s18, 2 }
  0x4f   : > { %s179_s4 = scalar_lea.sflag (!%p871_p13), [#allocation3], %s785_s18  ;;  %s182_s6 = scalar_lea.vmem (!%p871_p13), [#allocation2], %s385_s20 }
  0x55   : > { %581 = dma.done.wait (%p872_p3), %s179_s4, 64  }
  0x56   : > { %583 = vsyncadd (%p872_p3), %s179_s4, 4294967232  ;;  %s386_s5 = sshll.u32 %s785_s18, 1  ;;  %s188_s15 = scalar_lea.sflag [#allocation6], %s785_s18 }
  0x57   : > { %s191_s19 = scalar_lea.vmem [#allocation5], %s386_s5 }
  0x58   : > { %585 = dma.done.wait (%p872_p3), %s188_s15, 32  }
  0x59   : > { %587 = vsyncadd (%p872_p3), %s188_s15, 4294967264  ;;  %s800_s26 = scalar_lea.vmem [#allocation7], %s785_s18  ;;  %v620_v0 = vmov 0.0   ;;  %v221_v1 = vld [vmem:[%s191_s19] sm:$0x3]  ;;  %vm251_vm2 = vcmask 1041408  }
  0x5a   : > { %220 = vst [vmem:[%s800_s26] sm:$0x1] %v620_v0  ;;  %v223_v2 = vld [vmem:[%s182_s6] sm:$0x3]  ;;  %v387_v3 = vld [vmem:[%s182_s6 + $0x2] sm:$0x3]  ;;  %vm227_vm0 = vcmp.eq.s32.totalorder %v221_v1, 1  ;;  %v246_v19 = vcvt.s32.f32 %v221_v1 }
  0x5b   : > { %v226_v4 = vsub.f32 %v223_v2, %v387_v3  ;;  %vm222_vm1 = vcmp.ne.s32.totalorder %v221_v1, 4294967196  ;;  %s388_s21 = sshll.u32 %s606_s12, 4  ;;  %s275_s30 = sshll.u32 %s800_s26, 4  ;;  %s811_s30 = int_to_ptr.vmem [resolvable:$true] %s275_s30 }
  0x5c   : > { %v248_v22 = vmul.f32 0.6, %v246_v19  ;;  %s809_s29 = scalar_lea.hbm %s861_s2, %s388_s21  ;;  %s263_s3 = scalar_lea.sflag [#allocation4], %s785_s18 }
  0x5d   : > { %v228_v5 = vsub.f32 0.0, %v226_v4  ;;  %s528_s25 = scalar_lea.vmem %s811_s30, 16  ;;  %p873_p0 = scmp.ne.s32.totalorder %s866_s22, 0 }
  0x5e   : > { %v249_v25 = vadd.f32 0.7, %v248_v22  ;;  %p529_p8 = scmp.ne.s32.totalorder %s811_s30, %s528_s25  ;;  %s621_s12 = smov [#allocation7]  }
  0x5f   : > { %v229_v6 = vsel %vm227_vm0, %v226_v4, %v228_v5  ;;  %s532_s7 = sshll.u32 %s621_s12, 4  ;;  %s533_s7 = int_to_ptr.vmem [resolvable:$false] %s532_s7 }
  0x60   : > { %v231_v7 = vand.u32 2147483647, %v229_v6  ;;  %v230_v12 = vmax.f32 %v229_v6, 0.0  ;;  %p530_p11 = pnand %p529_p8, %p873_p0  ;;  %s534_s8 = scalar_lea.vmem %s533_s7, 32 }
  0x61   : > { %v259_v34 = vld [vmem:[%s800_s26] sm:$0x1]  ;;  %p535_p7 = scmp.lt.s32.totalorder %s811_s30, %s533_s7  ;;  %p536_p10 = scmp.lt.s32.totalorder %s534_s8, %s528_s25 }
  0x62   : > { %v232_v8 = vsub.f32 0.0, %v231_v7  ;;  %p531_p4 = pneg %p530_p11 }
  0x63   : > { %p537_p12 = por %p536_p10, %p535_p7 }
  0x64   : > { %v233_v9 = vmul.f32 1.442695, %v232_v8 }
  0x65   : > { %p538_p9 = pnand %p537_p12, %p531_p4 }
  0x66   : > { %462 = vpow2.f32 %v233_v9 }
  0x70   : > { %v463_v10 = vpop.eup %462 }
  0x71   : > { %v235_v11 = vadd.f32 1.0, %v463_v10 }
  0x73   : > { %464 = vlog2.f32 %v235_v11 }
  0x7d   : > { %v465_v13 = vpop.eup %464 }
  0x7e   : > { %v237_v14 = vmul.f32 0.6931472, %v465_v13 }
  0x80   : > { %v238_v15 = vadd.f32 %v237_v14, %v230_v12 }
  0x82   : > { %v239_v16 = vsel %vm222_vm1, %v238_v15, 0.0 }
  0x83   : > { %v240_v17 = vsub.f32 0.0, %v239_v16 }
  0x85   : > { %v241_v18 = vmul.f32 1.442695, %v240_v17 }
  0x87   : > { %466 = vpow2.f32 %v241_v18 }
  0x91   : > { %v467_v20 = vpop.eup %466 }
  0x92   : > { %v243_v21 = vsub.f32 1.0, %v467_v20 }
  0x94   : > { %v244_v23 = vmax.f32 %v243_v21, 0.0 }
  0x96   : > { %v245_v24 = vmul.f32 %v244_v23, %v244_v23 }
  0x98   : > { %v247_v26 = vmul.f32 %v245_v24, %v239_v16 }
  0x9a   : > { %v250_v27 = vmul.f32 %v249_v25, %v247_v26 }
  0x9c   : > { %v252_v28 = vsel %vm251_vm2, %v250_v27, 0.0 }
  0x9d   : > { %v253_v29 = vrot.slane %v252_v28, 4 }
  0x9f   : > { %v254_v30 = vadd.f32 %v253_v29, %v252_v28 }
  0xa1   : > { %v255_v31 = vrot.slane %v254_v30, 2 }
  0xa3   : > { %v256_v32 = vadd.f32 %v255_v31, %v254_v30 }
  0xa5   : > { %v257_v33 = vrot.slane %v256_v32, 1 }
  0xa7   : > { %v258_v35 = vadd.f32 %v257_v33, %v256_v32 }
  0xa9   : > { %v260_v36 = vadd.f32 %v259_v34, %v258_v35 }
  0xab   : > { %261 = vst [vmem:[%s800_s26] sm:$0x1] %v260_v36 }
  0xac   : > { %541 = shalt.err (!%p538_p9)
}
  0xad   : > { %s542_s16 = scalar_lea.hbm %s809_s29, 16  ;;  %s546_s4 = scalar_lea.hbm %s861_s2, 32 }
  0xae   : > { %p543_p1 = scmp.ne.s32.totalorder %s809_s29, %s542_s16  ;;  %p547_p5 = scmp.lt.u32.totalorder %s809_s29, %s861_s2 }
  0xaf   : > { %p548_p13 = scmp.lt.u32.totalorder %s546_s4, %s542_s16  ;;  %p550_p8 = scmp.lt.u32.totalorder %s542_s16, %s809_s29 }
  0xb0   : > { %p544_p6 = pnand %p543_p1, %p873_p0 }
  0xb1   : > { %p549_p3 = por %p548_p13, %p547_p5 }
  0xb2   : > { %p545_p2 = pneg %p544_p6 }
  0xb3   : > { %p551_p11 = por %p550_p8, %p549_p3 }
  0xb5   : > { %p552_p4 = pnand %p551_p11, %p545_p2 }
  0xb7   : > { %555 = shalt.err (!%p552_p4)
}
  0xb8   : > { %396 = dma.vmem_to_hbm [thread:$0]  (%p873_p0), %s811_s30, 16, %s809_s29, %s263_s3  }
  0xb9 PF: > { %s287_s15 = sand.u32 1, %s594_s9   ;;  %p874_p7 = scmp.ne.s32.totalorder %s867_s24, 0 }
  0xba   : > { %p875_p10 = scmp.ge.s32.totalorder %s614_s14, 2  ;;  %s288_s19 = scalar_lea.sflag [#allocation4], %s287_s15 }
  0xbc   : > { %p406_p12 = pnand %p875_p10, %p874_p7 }
  0xbe   : > { %589 = dma.done.wait (!%p406_p12), %s288_s19, 16  }
  0xbf   : > { %591 = vsyncadd (!%p406_p12), %s288_s19, 4294967280  ;;  %s21_s14 = sadd.s32 1, %s614_s14   ;;  %s876_s9 = smov %s598_s10 }
  0xc0   : > { %p18_p9 = scmp.ge.s32.totalorder %s21_s14, 4   ;;  %s877_s10 = smov %s602_s11 }
  0xc1   : > { %s878_s11 = smov %s693_s23  ;;  %s879_s12 = smov %s610_s13 }
  0xc2   : > { %s880_s13 = smov %s882_s17  ;;  %20 = sbr.rel (!%p18_p9) target bundleno = 8 (0x8), region = 91 }
  0xc9   :  { %292 = vsyncpa [#allocation3], 1 }
  0xca   :  { %294 = vsyncpa [#allocation3 + $0x1], 1 }
  0xcb   :  { %295 = vsyncpa [#allocation6], 1 }
  0xcc   :  { %297 = vsyncpa [#allocation6 + $0x1], 1 }
  0xcd   :  { %298 = vsyncpa [#allocation4], 1 }
  0xce   :  { %300 = vsyncpa [#allocation4 + $0x1], 1 }

</bundles_post_ra>
